<compile_context>
chip_gen: v7x
topology: tpu7x:2x2x1
jax: 0.10.0
libtpu: 0.0.40
codegen_flags: <defaults>
</compile_context>

<pallas_src>
import functools

import jax
import jax.numpy as jnp
from jax.experimental import pallas as pl
from jax.experimental.pallas import tpu as pltpu


def _round_up(x, m):
    return ((x + m - 1) // m) * m


# ---------------------------------------------------------------------------
# Kernels
# ---------------------------------------------------------------------------

def _linear_sigmoid_kernel(x_ref, w_ref, b_ref, o_ref):
    """Single-K-step kernel: o = sigmoid(x @ w + b).  x:(TM,TK), w:(TK,TN)."""
    acc = jnp.dot(x_ref[...], w_ref[...], preferred_element_type=jnp.float32)
    o_ref[...] = jax.nn.sigmoid(acc + b_ref[...])


def _linear_sigmoid_kernel_kloop(x_ref, w_ref, b_ref, o_ref):
    """Multi-K-step kernel: accumulate directly into the K-resident f32 output
    block; bias folded into the k==0 init, sigmoid applied at the last k."""
    k = pl.program_id(2)

    @pl.when(k == 0)
    def _():
        o_ref[...] = jnp.broadcast_to(b_ref[...], o_ref.shape)

    o_ref[...] += jnp.dot(x_ref[...], w_ref[...],
                          preferred_element_type=jnp.float32)

    @pl.when(k == pl.num_programs(2) - 1)
    def _():
        o_ref[...] = jax.nn.sigmoid(o_ref[...])


# ---------------------------------------------------------------------------
# Tiling / VMEM budgeting
# ---------------------------------------------------------------------------

def _vmem_limits():
    """(tile_budget_bytes, vmem_limit_bytes) derived from the chip's VMEM."""
    cap = None
    try:
        cap = getattr(pltpu.get_tpu_info(), "vmem_capacity_bytes", None)
    except Exception:
        cap = None
    if not cap:
        cap = 64 * 1024 * 1024  # conservative default: v7x has 64 MiB / TC
    vmem_limit = int(cap) * 3 // 4          # ~48 MiB on v7x, ~96 MiB on v5e/v6e
    tile_budget = int(vmem_limit * 0.85)    # cap for double-buffered tiles
    return tile_budget, vmem_limit


def _select_tiling(M, N_pad, K_pad, in_itemsize, budget):
    """Choose (M_pad, tm, tn, tk): tiles divide the padded dims, are MXU/lane
    aligned, and the double-buffered working set fits in `budget` bytes."""

    def working_set(tm, tn, tk):
        b = 2 * tm * tk * in_itemsize       # x tiles (double-buffered)
        b += 2 * tk * tn * in_itemsize      # w tiles
        b += 2 * 8 * tn * 4                 # bias row
        b += 2 * tm * tn * 4                # f32 output tiles
        return b

    def lane_tile(dim, cap):
        # Largest multiple of 128 dividing `dim` (dim is already x128), <= cap.
        if dim <= cap:
            return dim
        best, t = 128, 256
        while t <= cap:
            if dim % t == 0:
                best = t
            t += 128
        return best

    def m_tile(cap):
        # (M_pad, tm): tm multiple of 8 dividing M_pad, <= cap, preferring the
        # largest tile whose padding waste stays below ~6%.
        m_min = _round_up(M, 8)
        if m_min <= cap:
            return m_min, m_min
        waste_cap = max(8, M // 16)
        best_pad, best_t = m_min, 8
        t = 8
        while t <= cap:
            pad = _round_up(M, t)
            if pad - M <= waste_cap and t >= best_t:
                best_pad, best_t = pad, t
            t += 8
        return best_pad, best_t

    cap_sets = (
        (1024, 1024, 1 << 30),   # full K first (single K step, no K loop)
        (512, 512, 1 << 30),
        (256, 256, 1 << 30),
        (512, 512, 4096),
        (256, 512, 2048),
        (256, 256, 2048),
        (128, 256, 1024),
        (128, 128, 512),
        (64, 128, 512),
        (32, 128, 256),
        (16, 128, 256),
        (8, 128, 128),
    )
    for cap_m, cap_n, cap_k in cap_sets:
        tn = lane_tile(N_pad, cap_n)
        tk = lane_tile(K_pad, cap_k)
        m_pad, tm = m_tile(cap_m)
        if working_set(tm, tn, tk) <= budget:
            return m_pad, tm, tn, tk
    m_pad, tm = m_tile(8)
    return m_pad, tm, 128, 128


# ---------------------------------------------------------------------------
# Wrappers
# ---------------------------------------------------------------------------

def prepare_linear_params(weight, bias, compute_dtype=jnp.float32):
    """One-time re-layout of nn.Linear parameters for the Pallas kernel.

    weight: (N, K) [out_features, in_features] -> (K_pad, N_pad), K-major so
    the in-kernel contraction is the standard MXU form; bias -> (1, N_pad) f32.
    Call once outside the hot path and reuse across forward calls.
    """
    N, K = weight.shape
    N_pad = _round_up(N, 128)
    K_pad = _round_up(K, 128)
    w_kn = jnp.asarray(weight).T.astype(compute_dtype)          # (K, N)
    if (K_pad, N_pad) != (K, N):
        w_kn = jnp.pad(w_kn, ((0, K_pad - K), (0, N_pad - N)))
    b_row = jnp.asarray(bias, jnp.float32).reshape(1, N)
    if N_pad != N:
        b_row = jnp.pad(b_row, ((0, 0), (0, N_pad - N)))
    return w_kn, b_row, N


def linear_sigmoid(x, w_kn, b_row, out_features, *,
                   block_m=None, block_n=None, block_k=None):
    """sigmoid(x @ W^T + b) given params prepared by prepare_linear_params."""
    M, K = x.shape
    K_pad, N_pad = w_kn.shape
    if b_row.shape != (1, N_pad):
        raise ValueError("bias/weight layout mismatch")
    if K > K_pad:
        raise ValueError("x feature dim larger than prepared weight")

    if x.dtype != w_kn.dtype:
        x = x.astype(w_kn.dtype)
    in_itemsize = jnp.dtype(w_kn.dtype).itemsize

    tile_budget, vmem_limit = _vmem_limits()
    M_pad, tm, tn, tk = _select_tiling(M, N_pad, K_pad, in_itemsize, tile_budget)

    # Keep >=2 blocks on a parallel axis so both TensorCores of a v7x chip get
    # work; negligible cost (~0.35 us extra grid step) on 1-TC chips.
    if (M_pad // tm) * (N_pad // tn) == 1 and M >= 16:
        M_pad = _round_up(M, 16)
        tm = M_pad // 2

    # Optional explicit tile overrides (must divide the padded dims).
    if block_m is not None:
        M_pad = _round_up(M, block_m)
        tm = block_m
    if block_n is not None:
        if N_pad % block_n:
            raise ValueError("block_n must divide the padded N")
        tn = block_n
    if block_k is not None:
        if K_pad % block_k:
            raise ValueError("block_k must divide the padded K")
        tk = block_k

    # Only ragged rows / K columns of x need per-call padding.
    if (M_pad, K_pad) != (M, K):
        x = jnp.pad(x, ((0, M_pad - M), (0, K_pad - K)))

    grid_m, grid_n, grid_k = M_pad // tm, N_pad // tn, K_pad // tk
    out_shape = jax.ShapeDtypeStruct((M_pad, N_pad), jnp.float32)

    if grid_k == 1:
        kernel = _linear_sigmoid_kernel
        grid = (grid_m, grid_n)
        in_specs = [
            pl.BlockSpec((tm, tk), lambda i, j: (i, 0)),   # x tile
            pl.BlockSpec((tk, tn), lambda i, j: (0, j)),   # w tile (K, N)
            pl.BlockSpec((1, tn), lambda i, j: (0, j)),    # bias row
        ]
        out_specs = pl.BlockSpec((tm, tn), lambda i, j: (i, j))
        dim_sem = ("parallel", "parallel")
    else:
        kernel = _linear_sigmoid_kernel_kloop
        grid = (grid_m, grid_n, grid_k)
        in_specs = [
            pl.BlockSpec((tm, tk), lambda i, j, k: (i, k)),
            pl.BlockSpec((tk, tn), lambda i, j, k: (k, j)),
            pl.BlockSpec((1, tn), lambda i, j, k: (0, j)),
        ]
        out_specs = pl.BlockSpec((tm, tn), lambda i, j, k: (i, j))
        dim_sem = ("parallel", "parallel", "arbitrary")

    out = pl.pallas_call(
        kernel,
        out_shape=out_shape,
        grid_spec=pltpu.PrefetchScalarGridSpec(
            num_scalar_prefetch=0,
            grid=grid,
            in_specs=in_specs,
            out_specs=out_specs,
        ),
        compiler_params=pltpu.CompilerParams(
            dimension_semantics=dim_sem,
            vmem_limit_bytes=vmem_limit,
        ),
    )(x, w_kn, b_row)

    if (M_pad, N_pad) != (M, out_features):
        out = out[:M, :out_features]
    return out


def one_layer_nn(x, weight, bias, *, compute_dtype=jnp.float32, **tile_overrides):
    """Forward of OneLayerNN: sigmoid(x @ weight.T + bias).

    Convenience path (prepares params on every call); for repeated calls use
    prepare_linear_params once and call linear_sigmoid directly.
    """
    w_kn, b_row, n_out = prepare_linear_params(weight, bias, compute_dtype)
    return linear_sigmoid(x, w_kn, b_row, n_out, **tile_overrides)


if __name__ == "__main__":
    key = jax.random.PRNGKey(0)

    def make_case(k, batch, input_size, output_size):
        kx, kw, kb = jax.random.split(k, 3)
        bound = 1.0 / jnp.sqrt(jnp.float32(input_size))
        x = jax.random.normal(kx, (batch, input_size), dtype=jnp.float32)
        w = jax.random.uniform(kw, (output_size, input_size),
                               minval=-bound, maxval=bound, dtype=jnp.float32)
        b = jax.random.uniform(kb, (output_size,),
                               minval=-bound, maxval=bound, dtype=jnp.float32)
        return x, w, b

    k1, k2, k3 = jax.random.split(key, 3)

    # Case 1: small shapes matching OneLayerNN(input_size=32, output_size=16).
    x, w, b = make_case(k1, batch=8, input_size=32, output_size=16)
    out = jax.block_until_ready(one_layer_nn(x, w, b))
    ref = jax.nn.sigmoid(x @ w.T + b)
    assert out.shape == ref.shape
    assert jnp.allclose(out, ref, atol=1e-5, rtol=1e-5), "mismatch (small case)"

    # Case 2: divisor-friendly tiling at the problem's true size (384x640x384,
    # single K step, M split into two parallel blocks), params prepared once.
    x2, w2, b2 = make_case(k2, batch=384, input_size=640, output_size=384)
    w_kn, b_row, n_out = prepare_linear_params(w2, b2)
    fwd = jax.jit(functools.partial(linear_sigmoid, out_features=n_out))
    out2 = jax.block_until_ready(fwd(x2, w_kn, b_row))
    ref2 = jax.nn.sigmoid(
        jnp.dot(x2, w2.T, precision=jax.lax.Precision.HIGHEST) + b2)
    assert out2.shape == ref2.shape
    assert jnp.allclose(out2, ref2, atol=1e-3, rtol=1e-3), "mismatch (tiled case)"

    # Case 3: force the multi-K-step accumulation path (grid 2x2x4).
    x3, w3, b3 = make_case(k3, batch=128, input_size=512, output_size=256)
    out3 = jax.block_until_ready(
        one_layer_nn(x3, w3, b3, block_m=64, block_n=128, block_k=128))
    ref3 = jax.nn.sigmoid(
        jnp.dot(x3, w3.T, precision=jax.lax.Precision.HIGHEST) + b3)
    assert out3.shape == ref3.shape
    assert jnp.allclose(out3, ref3, atol=1e-3, rtol=1e-3), "mismatch (k-loop case)"

    # Case 4: optional bf16 MXU path (f32 accumulation), looser tolerance.
    out4 = jax.block_until_ready(
        one_layer_nn(x2, w2, b2, compute_dtype=jnp.bfloat16))
    assert jnp.allclose(out4, ref2, atol=2e-2, rtol=2e-2), "mismatch (bf16 case)"

    print("KERNEL_OK")
</pallas_src>

<mosaic_0001>
module attributes {stable_mosaic.version = 11 : i64} {
  func.func @_linear_sigmoid_kernel(%arg0: i32, %arg1: i32, %arg2: memref<8x128xf32, #tpu.memory_space<vmem>>, %arg3: memref<128x128xf32, #tpu.memory_space<vmem>>, %arg4: memref<1x128xf32, #tpu.memory_space<vmem>>, %arg5: memref<8x128xf32, #tpu.memory_space<vmem>>) attributes {dimension_semantics = [#tpu.dimension_semantics<parallel>, #tpu.dimension_semantics<parallel>], iteration_bounds = array<i64: 1, 1>, scalar_prefetch = 0 : i64, scratch_operands = 0 : i64, tpu.core_type = #tpu.core_type<tc>, window_params = [{transform_indices = @transform_0, window_bounds = array<i64: 8, 128>}, {transform_indices = @transform_1, window_bounds = array<i64: 128, 128>}, {transform_indices = @transform_2, window_bounds = array<i64: 1, 128>}, {transform_indices = @transform_3, window_bounds = array<i64: 8, 128>}]} {
    %c0 = arith.constant 0 : index
    %c0_0 = arith.constant 0 : index
    %0 = vector.load %arg2[%c0, %c0_0] : memref<8x128xf32, #tpu.memory_space<vmem>>, vector<8x128xf32>
    %c0_1 = arith.constant 0 : index
    %c0_2 = arith.constant 0 : index
    %1 = vector.load %arg3[%c0_1, %c0_2] : memref<128x128xf32, #tpu.memory_space<vmem>>, vector<128x128xf32>
    %cst = arith.constant dense<0.000000e+00> : vector<8x128xf32>
    %2 = tpu.matmul %0, %1, %cst {dimension_numbers = #tpu.dot_dimension_numbers<[1], [0], [0], [1], [0, 0, 1, 1], [], []>} : vector<8x128xf32>, vector<128x128xf32>, vector<8x128xf32> -> vector<8x128xf32>
    %c0_3 = arith.constant 0 : index
    %c0_4 = arith.constant 0 : index
    %3 = vector.load %arg4[%c0_3, %c0_4] : memref<1x128xf32, #tpu.memory_space<vmem>>, vector<1x128xf32>
    %4 = vector.broadcast %3 : vector<1x128xf32> to vector<8x128xf32>
    %5 = arith.addf %2, %4 : vector<8x128xf32>
    %6 = arith.negf %5 : vector<8x128xf32>
    %7 = math.exp %6 : vector<8x128xf32>
    %cst_5 = arith.constant 1.000000e+00 : f32
    %8 = vector.broadcast %cst_5 : f32 to vector<8x128xf32>
    %9 = arith.addf %8, %7 : vector<8x128xf32>
    %10 = arith.divf %8, %9 : vector<8x128xf32>
    %c0_6 = arith.constant 0 : index
    %c0_7 = arith.constant 0 : index
    %11 = vector.load %arg5[%c0_6, %c0_7] : memref<8x128xf32, #tpu.memory_space<vmem>>, vector<8x128xf32>
    tpu.vector_store %arg5[%c0_6, %c0_7], %10 {strides = array<i32>} : memref<8x128xf32, #tpu.memory_space<vmem>>, vector<8x128xf32>,
    return
  }
  func.func @transform_0(%arg0: i32, %arg1: i32) -> (i32, i32) {
    %c0_i32 = arith.constant 0 : i32
    %c0_i32_0 = arith.constant 0 : i32
    return %arg0, %c0_i32 : i32, i32
  }
  func.func @transform_1(%arg0: i32, %arg1: i32) -> (i32, i32) {
    %c0_i32 = arith.constant 0 : i32
    %c0_i32_0 = arith.constant 0 : i32
    return %c0_i32, %arg1 : i32, i32
  }
  func.func @transform_2(%arg0: i32, %arg1: i32) -> (i32, i32) {
    %c0_i32 = arith.constant 0 : i32
    %c0_i32_0 = arith.constant 0 : i32
    return %c0_i32, %arg1 : i32, i32
  }
  func.func @transform_3(%arg0: i32, %arg1: i32) -> (i32, i32) {
    %c0_i32 = arith.constant 0 : i32
    return %arg0, %arg1 : i32, i32
  }
}

</mosaic_0001>

<bundles_post_ra>
// kernel: tpu_custom_call.1
= control target key start
LH: loop header
LB: loop body
LE: loop exit
PB: predicated region body
PF: predicated region fallthrough
CT: control target
= control target key end

     0   :  { %8 = vsyncpa [#allocation3], 0  ;;  %s394_s0 = inlined_call_operand.hbm [shape: f32[8,128], index: 0, kind: input, shape index: {}]   ;;  %s395_s1 = inlined_call_operand.hbm [shape: f32[128,128], index: 1, kind: input, shape index: {}]   ;;  %s396_s2 = inlined_call_operand.vmem [shape: f32[1,128], index: 2, kind: input, shape index: {}]   ;;  %s397_s3 = inlined_call_operand.hbm [shape: f32[8,128], index: 3, kind: output, shape index: {}]  }
   0x1   :  { %9 = vsyncpa [#allocation6], 0 }
   0x2   :  { %10 = vsyncpa [#allocation4], 0  ;;  %s320_s12 = smov [#allocation2]   ;;  %s321_s14 = smov [#allocation5]  }
   0x3   :  { %s17_s13 = sshll.u32 %s320_s12, 4  ;;  %s26_s15 = sshll.u32 %s321_s14, 4  ;;  %s18_s13 = int_to_ptr.vmem [resolvable:$true] %s17_s13  ;;  %s348_s15 = int_to_ptr.vmem [resolvable:$true] %s26_s15 }
   0x4   :  { %s248_s18 = scalar_lea.hbm %s394_s0, 128 }
   0x5   :  { %p249_p0 = scmp.ne.s32.totalorder %s394_s0, %s248_s18  ;;  %p252_p1 = scmp.lt.u32.totalorder %s248_s18, %s394_s0 }
   0x7   :  { %p254_p2 = pnand %p252_p1, %p249_p0 }
   0x9   :  { %257 = shalt.err (!%p254_p2)
}
   0xa   :  { %s258_s23 = scalar_lea.vmem %s18_s13, 128  ;;  %p263_p4 = scmp.lt.s32.totalorder %s18_s13, %s18_s13 }
   0xb   :  { %p259_p3 = scmp.ne.s32.totalorder %s18_s13, %s258_s23  ;;  %p264_p5 = scmp.lt.s32.totalorder %s258_s23, %s258_s23 }
   0xd   :  { %p265_p6 = por %p264_p5, %p263_p4 }
   0xf   :  { %p266_p7 = pnand %p265_p6, %p259_p3 }
  0x11   :  { %269 = shalt.err (!%p266_p7)
}
  0x12   :  { %20 = dma.hbm_to_vmem [thread:$0]  %s394_s0, 128, %s18_s13, [#allocation3]  }
  0x13   :  { %s270_s28 = scalar_lea.hbm %s395_s1, 2048 }
  0x14   :  { %p271_p8 = scmp.ne.s32.totalorder %s395_s1, %s270_s28  ;;  %p274_p9 = scmp.lt.u32.totalorder %s270_s28, %s395_s1 }
  0x16   :  { %p276_p10 = pnand %p274_p9, %p271_p8 }
  0x18   :  { %279 = shalt.err (!%p276_p10)
}
  0x19   :  { %s280_s6 = scalar_lea.vmem %s348_s15, 2048  ;;  %p285_p12 = scmp.lt.s32.totalorder %s348_s15, %s348_s15 }
  0x1a   :  { %p281_p11 = scmp.ne.s32.totalorder %s348_s15, %s280_s6  ;;  %p286_p13 = scmp.lt.s32.totalorder %s280_s6, %s280_s6 }
  0x1c   :  { %p287_p0 = por %p286_p13, %p285_p12 }
  0x1e   :  { %p288_p1 = pnand %p287_p0, %p281_p11 }
  0x20   :  { %291 = shalt.err (!%p288_p1)
}
  0x21   :  { %s322_s0 = smov 128   ;;  %s323_s7 = smov 8  }
  0x22   :  { %32 = dma.hbm_to_vmem [thread:$0]  %s395_s1, 2048, %s348_s15, [#allocation6], %s322_s0, %s322_s0, %s323_s7  }
  0x23   :  { %314 = dma.done.wait [#allocation3], 128  }
  0x24   :  { %315 = vsyncadd [#allocation3], 4294967168 }
  0x25   :  { %316 = dma.done.wait [#allocation6], 2048  }
  0x26   :  { %317 = vsyncadd [#allocation6], 4294965248  ;;  %v324_v0 = vmov 0.0|0.0   ;;  %vm325_vm0 = vmmov 0   ;;  %v326_v1 = vmov 0.0   ;;  %v42_v2 = vld [vmem:[#allocation5] sm:$0xff] }
  0x27   :  { %212 = vmatprep.subr.bf16.mxu0 %v324_v0  ;;  %209 = vmatprep.mubr.msk.f32.mxu0 %vm325_vm0, %v326_v1  ;;  %v43_v3 = vld [vmem:[#allocation5 + $0x8] sm:$0xff]  ;;  %v44_v4 = vld [vmem:[#allocation5 + $0x10] sm:$0xff]  ;;  %v45_v6 = vld [vmem:[#allocation5 + $0x18] sm:$0xff]  ;;  %s327_s11 = smov [#allocation7]  }
  0x28   :  { %v213_v5 = vpack.c.bf16 %v43_v3, %v42_v2  ;;  %v216_v7 = vpack.c.bf16 %v45_v6, %v44_v4  ;;  %v46_v8 = vld [vmem:[#allocation5 + $0x20] sm:$0xff]  ;;  %v47_v9 = vld [vmem:[#allocation5 + $0x28] sm:$0xff]  ;;  %v48_v11 = vld [vmem:[#allocation5 + $0x30] sm:$0xff]  ;;  %s148_s12 = sshll.u32 %s327_s11, 4  ;;  %s149_s12 = int_to_ptr.vmem [resolvable:$true] %s148_s12 }
  0x29   :  { %v219_v10 = vpack.c.bf16 %v47_v9, %v46_v8  ;;  %v49_v12 = vld [vmem:[#allocation5 + $0x38] sm:$0xff]  ;;  %v50_v14 = vld [vmem:[#allocation5 + $0x40] sm:$0xff]  ;;  %v51_v15 = vld [vmem:[#allocation5 + $0x48] sm:$0xff]  ;;  %s292_s13 = scalar_lea.vmem %s149_s12, 128  ;;  %p297_p3 = scmp.lt.s32.totalorder %s149_s12, %s149_s12 }
  0x2a   :  { %214 = vmatpush3.bf16.msra.mxu0 %v213_v5  ;;  %v222_v13 = vpack.c.bf16 %v49_v12, %v48_v11  ;;  %v225_v16 = vpack.c.bf16 %v51_v15, %v50_v14  ;;  %v52_v17 = vld [vmem:[#allocation5 + $0x50] sm:$0xff]  ;;  %v53_v18 = vld [vmem:[#allocation5 + $0x58] sm:$0xff]  ;;  %v54_v20 = vld [vmem:[#allocation5 + $0x60] sm:$0xff]  ;;  %p293_p2 = scmp.ne.s32.totalorder %s149_s12, %s292_s13  ;;  %p298_p4 = scmp.lt.s32.totalorder %s292_s13, %s292_s13 }
  0x2b   :  { %215 = vmatprep.subr.bf16.mxu0 %v324_v0  ;;  %v228_v19 = vpack.c.bf16 %v53_v18, %v52_v17  ;;  %v55_v21 = vld [vmem:[#allocation5 + $0x68] sm:$0xff]  ;;  %v56_v23 = vld [vmem:[#allocation5 + $0x70] sm:$0xff]  ;;  %v57_v24 = vld [vmem:[#allocation5 + $0x78] sm:$0xff] }
  0x2c   :  { %v231_v22 = vpack.c.bf16 %v55_v21, %v54_v20  ;;  %v234_v25 = vpack.c.bf16 %v57_v24, %v56_v23  ;;  %v41_v26 = vld [vmem:[#allocation2] sm:$0xff]  ;;  %p299_p5 = por %p298_p4, %p297_p3 }
  0x2d   :  { %v158_v27 = vld [vmem:[%s396_s2] ss:$0 sm:$0xff] }
  0x2e   :  { %217 = vmatpush3.bf16.msra.mxu0 %v216_v7  ;;  %p300_p6 = pnand %p299_p5, %p293_p2 }
  0x2f   :  { %218 = vmatprep.subr.bf16.mxu0 %v324_v0 }
  0x32   :  { %220 = vmatpush3.bf16.msra.mxu0 %v219_v10 }
  0x33   :  { %221 = vmatprep.subr.bf16.mxu0 %v324_v0 }
  0x36   :  { %223 = vmatpush3.bf16.msra.mxu0 %v222_v13 }
  0x37   :  { %224 = vmatprep.subr.bf16.mxu0 %v324_v0 }
  0x3a   :  { %226 = vmatpush3.bf16.msra.mxu0 %v225_v16 }
  0x3b   :  { %227 = vmatprep.subr.bf16.mxu0 %v324_v0 }
  0x3e   :  { %229 = vmatpush3.bf16.msra.mxu0 %v228_v19 }
  0x3f   :  { %230 = vmatprep.subr.bf16.mxu0 %v324_v0 }
  0x42   :  { %232 = vmatpush3.bf16.msra.mxu0 %v231_v22 }
  0x43   :  { %233 = vmatprep.subr.bf16.mxu0 %v324_v0 }
  0x46   :  { %235 = vmatpush3.bf16.msra.mxu0 %v234_v25 }
  0x49   :  { %210 = vmatmul.mubr.f32.vlgmr.msra.gmra.mrb[0].mxu0 %v41_v26 }
 0x11c   :  { %v131_v28 = vpop.f32.mrb[0].mxu0 }
 0x11d   :  { %v132_v29 = vadd.f32 %v158_v27, %v131_v28  ;;  %v211_v30 = vpop.f32.mrb[1].mxu0 }
 0x11f   :  { %v159_v31 = vmul.f32 -1.442695, %v132_v29 }
 0x121   :  { %244 = vpow2.f32 %v159_v31 }
 0x12b   :  { %v245_v32 = vpop.eup %244 }
 0x12c   :  { %v138_v33 = vadd.f32 1.0, %v245_v32 }
 0x12e   :  { %246 = vrcp.f32 %v138_v33 }
 0x138   :  { %v247_v34 = vpop.eup %246 }
 0x139   :  { %141 = vst [vmem:[#allocation7] sm:$0xff] %v247_v34 }
 0x13a   :  { %303 = shalt.err (!%p300_p6)
}
 0x13b   :  { %s304_s15 = scalar_lea.hbm %s397_s3, 128 }
 0x13c   :  { %p305_p7 = scmp.ne.s32.totalorder %s397_s3, %s304_s15  ;;  %p308_p8 = scmp.lt.u32.totalorder %s304_s15, %s397_s3 }
 0x13e   :  { %p310_p9 = pnand %p308_p8, %p305_p7 }
 0x140   :  { %313 = shalt.err (!%p310_p9)
}
 0x141   :  { %151 = dma.vmem_to_hbm [thread:$0]  %s149_s12, 128, %s397_s3, [#allocation4]  }
 0x142   :  { %318 = dma.done.wait [#allocation4], 128  }
 0x143   :  { %319 = vsyncadd [#allocation4], 4294967168 }
 0x144   :  { %155 = vsyncpa [#allocation3], 1 }
 0x145   :  { %156 = vsyncpa [#allocation6], 1 }
 0x146   :  { %157 = vsyncpa [#allocation4], 1 }

</bundles_post_ra>
